<compile_context>
chip_gen: v7x
topology: tpu7x:2x2x1
jax: 0.10.0
libtpu: 0.0.40
codegen_flags: <defaults>
</compile_context>

<pallas_src>
import functools

import jax
import jax.numpy as jnp
from jax import lax
from jax.experimental import pallas as pl
from jax.experimental.pallas import tpu as pltpu


# -----------------------------------------------------------------------------
# Pallas kernel: one (channel, K-tile) per grid step.
#   x_ref : (1, B, HW)  bf16  input rows for this channel (resident across k)
#   m_ref : (1, TK, HW) bf16  conv-as-matmul operator tile
#   z_ref : (1, B, HW)  bf16  pre-generated standard-normal noise (resident)
#   o_ref : (1, B, HW)  f32   output block; doubles as the f32 accumulator
# -----------------------------------------------------------------------------
def psfconv_kernel(x_ref, m_ref, z_ref, o_ref, *, tk,
                   signification_factor, noise_ratio, eps):
    k = pl.program_id(1)

    @pl.when(k == 0)
    def _():
        o_ref[...] = jnp.zeros_like(o_ref)

    # --- optical: fftconvolve(x, psf, mode='same') as an MXU matmul ----------
    # Slice the K chunk from the resident x block; bf16 operands, f32 acc
    # directly into the (resident) output block.
    off = pl.multiple_of(k * tk, 128)
    xk = x_ref[0, :, pl.ds(off, tk)]                       # (B, TK) bf16
    o_ref[0] += jnp.dot(xk, m_ref[0], preferred_element_type=jnp.float32)

    # --- epilogue on the last K tile (noise, clip, instance-norm), all f32 ---
    @pl.when(k == pl.num_programs(1) - 1)
    def _():
        y = o_ref[0]                                        # (B, HW) f32
        sf = signification_factor
        var = (2.52 / sf) ** 2 + y / sf / 64.0
        var = jnp.maximum(var, 0.0)     # guard sqrt against bf16 rounding
        y = y + noise_ratio * z_ref[0].astype(jnp.float32) * jnp.sqrt(var)

        # clip(min=0)
        y = jnp.maximum(y, 0.0)

        # InstanceNorm2d (no affine): per (b, c) over spatial, biased variance.
        mean = jnp.mean(y, axis=-1, keepdims=True)
        d = y - mean
        var_s = jnp.mean(d * d, axis=-1, keepdims=True)
        o_ref[0] = (d * lax.rsqrt(var_s + eps)).astype(o_ref.dtype)


# -----------------------------------------------------------------------------
# Glue: build the per-channel "same"-mode conv operator from the PSF.
#   y[b, c, i, j] = sum_{p,q} x[b, c, p, q] * psf[c, i+oh-p, j+ow-q]
# with oh=(H-1)//2, ow=(W-1)//2 (scipy fftconvolve mode='same' centering).
# Returned M has shape (C, H*W, H*W) with M[c, p*W+q, i*W+j], in float32.
# Build this ONCE per PSF and reuse it across forward calls.
# -----------------------------------------------------------------------------
def build_conv_operators(psf):
    C, H, W = psf.shape
    oh, ow = (H - 1) // 2, (W - 1) // 2
    p = jnp.arange(H)[:, None, None, None]
    q = jnp.arange(W)[None, :, None, None]
    i = jnp.arange(H)[None, None, :, None]
    j = jnp.arange(W)[None, None, None, :]
    u = i + oh - p                    # (H, 1, H, 1)
    v = j + ow - q                    # (1, W, 1, W)
    valid = (u >= 0) & (u < H) & (v >= 0) & (v < W)     # (H, W, H, W)
    uc = jnp.clip(u, 0, H - 1)
    vc = jnp.clip(v, 0, W - 1)
    vals = psf[:, uc, vc]             # (C, H, W, H, W)
    M = jnp.where(valid, vals, 0.0).reshape(C, H * W, H * W)
    return M.astype(jnp.float32)


# -----------------------------------------------------------------------------
# Generation-aware tiling helpers.
# -----------------------------------------------------------------------------
def _vmem_capacity_bytes():
    try:
        cap = getattr(pltpu.get_tpu_info(), "vmem_capacity_bytes", None)
        if cap:
            return int(cap)
    except Exception:
        pass
    return 64 * 1024 * 1024          # conservative fallback (v7x per-TC VMEM)


def _pick_tile_k(B, HW, vmem_cap):
    """Largest 128-multiple divisor of HW whose M double buffer fits VMEM."""
    budget = int(vmem_cap * 0.70)                 # leave headroom
    bpad = ((B + 7) // 8) * 8                     # sublane padding of (B, HW)
    # x (bf16) + z (bf16) + out (f32) double buffers, all resident per channel.
    fixed = 2 * bpad * HW * 2 + 2 * bpad * HW * 2 + 2 * bpad * HW * 4
    avail = max(budget - fixed, 2 * 128 * HW * 2)
    max_tk = (avail // (2 * HW * 2)) // 128 * 128  # from 2*tk*HW*2 bytes
    max_tk = max(128, min(max_tk, HW))
    tk = 128
    for d in range(128, max_tk + 1, 128):
        if HW % d == 0:
            tk = d
    return tk, fixed


# -----------------------------------------------------------------------------
# Wrapper: PsfConv.forward
#   x      : (B, C, H, W)   image
#   conv_op: (C, HW, HW)    bf16 precomputed "same"-conv operator (built once
#                           from the PSF via build_conv_operators + bf16 cast)
#   noise  : (B, C, H, W)   standard-normal noise (torch.randn_like equivalent)
# -----------------------------------------------------------------------------
def psf_conv_forward(x, conv_op, noise, *, expected_light_intensity=6400.0,
                     noise_ratio=1.0, eps=1e-5, tk=None):
    B, C, H, W = x.shape
    HW = H * W
    assert conv_op.shape == (C, HW, HW)
    assert HW % 128 == 0, "H*W must be a multiple of 128 for TPU lane tiling"

    vmem_cap = _vmem_capacity_bytes()
    if tk is None:
        tk, fixed = _pick_tile_k(B, HW, vmem_cap)
    else:
        _, fixed = _pick_tile_k(B, HW, vmem_cap)
    assert tk % 128 == 0 and HW % tk == 0, "tk must be a 128-multiple dividing H*W"
    n_k = HW // tk

    # module: if x.min() < 0, shift to non-negative
    x = x - jnp.minimum(jnp.min(x), 0.0)

    # bf16 matmul / noise operands; accumulation + epilogue stay f32.
    M = conv_op.astype(jnp.bfloat16)                                   # (C, HW, HW)
    xk = jnp.transpose(x, (1, 0, 2, 3)).reshape(C, B, HW).astype(jnp.bfloat16)
    zk = jnp.transpose(noise, (1, 0, 2, 3)).reshape(C, B, HW).astype(jnp.bfloat16)

    kernel = functools.partial(
        psfconv_kernel,
        tk=tk,
        signification_factor=9800.0 / float(expected_light_intensity),
        noise_ratio=float(noise_ratio),
        eps=float(eps),
    )

    # VMEM limit: actual need (M double buffer + resident blocks) with margin,
    # capped at 75% of this generation's physical VMEM.
    need = fixed + 2 * tk * HW * 2
    vmem_limit = int(min(max(2 * need, 32 * 1024 * 1024),
                         int(vmem_cap * 0.75)))

    cost = pl.CostEstimate(
        flops=int(2 * C * B * HW * HW),
        transcendentals=int(2 * C * B * HW),
        bytes_accessed=int(C * HW * HW * 2 + C * B * HW * (2 + 2 + 4)),
    )

    out = pl.pallas_call(
        kernel,
        out_shape=jax.ShapeDtypeStruct((C, B, HW), jnp.float32),
        grid_spec=pltpu.PrefetchScalarGridSpec(
            num_scalar_prefetch=0,
            grid=(C, n_k),
            in_specs=[
                pl.BlockSpec((1, B, HW), lambda c, k: (c, 0, 0)),   # x, resident
                pl.BlockSpec((1, tk, HW), lambda c, k: (c, k, 0)),  # M, K-tiled
                pl.BlockSpec((1, B, HW), lambda c, k: (c, 0, 0)),   # noise
            ],
            out_specs=pl.BlockSpec((1, B, HW), lambda c, k: (c, 0, 0)),
        ),
        compiler_params=pltpu.CompilerParams(
            dimension_semantics=("parallel", "arbitrary"),
            vmem_limit_bytes=vmem_limit),
        cost_estimate=cost,
    )(xk, M, zk)

    return jnp.transpose(out.reshape(C, B, H, W), (1, 0, 2, 3))


# -----------------------------------------------------------------------------
# Pure-JAX reference (f32 end-to-end) for correctness checking.
# -----------------------------------------------------------------------------
def psf_conv_reference(x, psf, noise, *, expected_light_intensity=6400.0,
                       noise_ratio=1.0, eps=1e-5):
    B, C, H, W = x.shape
    HW = H * W
    x = x - jnp.minimum(jnp.min(x), 0.0)
    M = build_conv_operators(psf)                                      # (C, HW, HW)
    xk = jnp.transpose(x, (1, 0, 2, 3)).reshape(C, B, HW)
    zk = jnp.transpose(noise, (1, 0, 2, 3)).reshape(C, B, HW)
    y = jnp.einsum('cbk,ckn->cbn', xk, M)
    sf = 9800.0 / float(expected_light_intensity)
    var = jnp.maximum((2.52 / sf) ** 2 + y / sf / 64.0, 0.0)
    y = y + noise_ratio * zk * jnp.sqrt(var)
    y = jnp.maximum(y, 0.0)
    mean = jnp.mean(y, axis=-1, keepdims=True)
    d = y - mean
    var_s = jnp.mean(d * d, axis=-1, keepdims=True)
    o = d * lax.rsqrt(var_s + eps)
    return jnp.transpose(o.reshape(C, B, H, W), (1, 0, 2, 3))


if __name__ == "__main__":
    B, C, H, W = 2, 3, 16, 16

    key = jax.random.PRNGKey(0)
    kx, kr, ki, kn = jax.random.split(key, 4)

    # Input image (non-negative, like normalized pixel intensities), NCHW.
    x = jax.random.uniform(kx, (B, C, H, W), dtype=jnp.float32)

    # Deterministic synthetic intensity PSF = |complex field|^2, one per
    # wavelength (3 RGB wavelengths -> 3 channels), standing in for the
    # angular-spectrum-propagated mask of compute_intensity_psf().
    re = jax.random.normal(kr, (C, H, W), dtype=jnp.float32)
    im = jax.random.normal(ki, (C, H, W), dtype=jnp.float32)
    psf = (re * re + im * im) / float(H * W)

    # Standard-normal noise (torch.randn_like equivalent), generated host-side.
    noise = jax.random.normal(kn, (B, C, H, W), dtype=jnp.float32)

    # Build the conv operator ONCE (depends only on the PSF) and reuse it.
    conv_op = jax.block_until_ready(build_conv_operators(psf))

    out = psf_conv_forward(x, conv_op, noise)
    out = jax.block_until_ready(out)

    assert out.shape == (B, C, H, W), out.shape
    assert out.dtype == jnp.float32
    assert bool(jnp.isfinite(out).all())

    ref = psf_conv_reference(x, psf, noise)
    max_err = float(jnp.max(jnp.abs(out - ref)))
    assert max_err < 0.15, f"max abs error vs f32 reference too large: {max_err}"

    print("KERNEL_OK")
</pallas_src>

<mosaic_0001>
module attributes {stable_mosaic.version = 11 : i64} {
  func.func @psfconv_kernel(%arg0: i32, %arg1: i32, %arg2: memref<1x2x256xbf16, #tpu.memory_space<vmem>>, %arg3: memref<1x256x256xbf16, #tpu.memory_space<vmem>>, %arg4: memref<1x2x256xbf16, #tpu.memory_space<vmem>>, %arg5: memref<1x2x256xf32, #tpu.memory_space<vmem>>) attributes {dimension_semantics = [#tpu.dimension_semantics<parallel>, #tpu.dimension_semantics<arbitrary>], iteration_bounds = array<i64: 3, 1>, scalar_prefetch = 0 : i64, scratch_operands = 0 : i64, tpu.core_type = #tpu.core_type<tc>, window_params = [{transform_indices = @transform_0, window_bounds = array<i64: 1, 2, 256>}, {transform_indices = @transform_1, window_bounds = array<i64: 1, 256, 256>}, {transform_indices = @transform_2, window_bounds = array<i64: 1, 2, 256>}, {transform_indices = @transform_3, window_bounds = array<i64: 1, 2, 256>}]} {
    %c0_i32 = arith.constant 0 : i32
    %0 = arith.cmpi eq, %arg1, %c0_i32 : i32
    %1 = arith.extui %0 : i1 to i32
    %c0_i32_0 = arith.constant 0 : i32
    %2 = arith.cmpi ne, %1, %c0_i32_0 : i32
    scf.if %2 {
      %cst_13 = arith.constant 0.000000e+00 : f32
      %20 = vector.broadcast %cst_13 : f32 to vector<1x2x256xf32>
      %c0_14 = arith.constant 0 : index
      %c0_15 = arith.constant 0 : index
      %c0_16 = arith.constant 0 : index
      %21 = vector.load %arg5[%c0_14, %c0_15, %c0_16] : memref<1x2x256xf32, #tpu.memory_space<vmem>>, vector<1x2x256xf32>
      tpu.vector_store %arg5[%c0_14, %c0_15, %c0_16], %20 {strides = array<i32>} : memref<1x2x256xf32, #tpu.memory_space<vmem>>, vector<1x2x256xf32>,
    } else {
    }
    %c256_i32 = arith.constant 256 : i32
    %3 = arith.muli %arg1, %c256_i32 : i32
    %4 = tpu.assume_multiple %3, 128 : i32
    %c0 = arith.constant 0 : index
    %c0_1 = arith.constant 0 : index
    %5 = arith.index_cast %4 : i32 to index
    %6 = vector.load %arg2[%c0, %c0_1, %5] : memref<1x2x256xbf16, #tpu.memory_space<vmem>>, vector<1x2x256xbf16>
    %7 = vector.shape_cast %6 : vector<1x2x256xbf16> to vector<2x256xbf16>
    %c0_2 = arith.constant 0 : index
    %c0_3 = arith.constant 0 : index
    %c0_4 = arith.constant 0 : index
    %8 = vector.load %arg5[%c0_2, %c0_3, %c0_4] : memref<1x2x256xf32, #tpu.memory_space<vmem>>, vector<1x2x256xf32>
    %9 = vector.shape_cast %8 : vector<1x2x256xf32> to vector<2x256xf32>
    %c0_5 = arith.constant 0 : index
    %c0_6 = arith.constant 0 : index
    %c0_7 = arith.constant 0 : index
    %10 = vector.load %arg3[%c0_5, %c0_6, %c0_7] : memref<1x256x256xbf16, #tpu.memory_space<vmem>>, vector<1x256x256xbf16>
    %11 = vector.shape_cast %10 : vector<1x256x256xbf16> to vector<256x256xbf16>
    %cst = arith.constant dense<0.000000e+00> : vector<2x256xf32>
    %12 = tpu.matmul %7, %11, %cst {dimension_numbers = #tpu.dot_dimension_numbers<[1], [0], [0], [1], [0, 0, 1, 1], [], []>} : vector<2x256xbf16>, vector<256x256xbf16>, vector<2x256xf32> -> vector<2x256xf32>
    %13 = arith.addf %9, %12 : vector<2x256xf32>
    %c0_8 = arith.constant 0 : index
    %c0_9 = arith.constant 0 : index
    %c0_10 = arith.constant 0 : index
    %14 = vector.load %arg5[%c0_8, %c0_9, %c0_10] : memref<1x2x256xf32, #tpu.memory_space<vmem>>, vector<1x2x256xf32>
    %15 = vector.shape_cast %14 : vector<1x2x256xf32> to vector<2x256xf32>
    %16 = vector.shape_cast %13 : vector<2x256xf32> to vector<1x2x256xf32>
    tpu.vector_store %arg5[%c0_8, %c0_9, %c0_10], %16 {strides = array<i32>} : memref<1x2x256xf32, #tpu.memory_space<vmem>>, vector<1x2x256xf32>,
    %c0_i32_11 = arith.constant 0 : i32
    %17 = arith.cmpi eq, %arg1, %c0_i32_11 : i32
    %18 = arith.extui %17 : i1 to i32
    %c0_i32_12 = arith.constant 0 : i32
    %19 = arith.cmpi ne, %18, %c0_i32_12 : i32
    scf.if %19 {
      %c0_13 = arith.constant 0 : index
      %c0_14 = arith.constant 0 : index
      %c0_15 = arith.constant 0 : index
      %20 = vector.load %arg5[%c0_13, %c0_14, %c0_15] : memref<1x2x256xf32, #tpu.memory_space<vmem>>, vector<1x2x256xf32>
      %21 = vector.shape_cast %20 : vector<1x2x256xf32> to vector<2x256xf32>
      %cst_16 = arith.constant 1.531250e+00 : f32
      %22 = vector.broadcast %cst_16 : f32 to vector<2x256xf32>
      %23 = arith.divf %21, %22 : vector<2x256xf32>
      %cst_17 = arith.constant 6.400000e+01 : f32
      %24 = vector.broadcast %cst_17 : f32 to vector<2x256xf32>
      %25 = arith.divf %23, %24 : vector<2x256xf32>
      %cst_18 = arith.constant 2.70837545 : f32
      %26 = vector.broadcast %cst_18 : f32 to vector<2x256xf32>
      %27 = arith.addf %26, %25 : vector<2x256xf32>
      %cst_19 = arith.constant 0.000000e+00 : f32
      %28 = vector.broadcast %cst_19 : f32 to vector<2x256xf32>
      %29 = arith.maximumf %27, %28 : vector<2x256xf32>
      %c0_20 = arith.constant 0 : index
      %c0_21 = arith.constant 0 : index
      %c0_22 = arith.constant 0 : index
      %30 = vector.load %arg4[%c0_20, %c0_21, %c0_22] : memref<1x2x256xbf16, #tpu.memory_space<vmem>>, vector<1x2x256xbf16>
      %31 = vector.shape_cast %30 : vector<1x2x256xbf16> to vector<2x256xbf16>
      %32 = arith.extf %31 : vector<2x256xbf16> to vector<2x256xf32>
      %cst_23 = arith.constant 1.000000e+00 : f32
      %33 = vector.broadcast %cst_23 : f32 to vector<2x256xf32>
      %34 = arith.mulf %33, %32 : vector<2x256xf32>
      %35 = math.sqrt %29 : vector<2x256xf32>
      %36 = arith.mulf %34, %35 : vector<2x256xf32>
      %37 = arith.addf %21, %36 : vector<2x256xf32>
      %cst_24 = arith.constant 0.000000e+00 : f32
      %38 = vector.broadcast %cst_24 : f32 to vector<2x256xf32>
      %39 = arith.maximumf %37, %38 : vector<2x256xf32>
      %cst_25 = arith.constant dense<0.000000e+00> : vector<2xf32>
      %40 = vector.multi_reduction <add>, %39, %cst_25 [1] : vector<2x256xf32> to vector<2xf32>
      %41 = vector.shape_cast %40 : vector<2xf32> to vector<2x1xf32>
      %cst_26 = arith.constant 2.560000e+02 : f32
      %42 = vector.broadcast %cst_26 : f32 to vector<2x1xf32>
      %43 = arith.divf %41, %42 : vector<2x1xf32>
      %44 = vector.broadcast %43 : vector<2x1xf32> to vector<2x256xf32>
      %45 = arith.subf %39, %44 : vector<2x256xf32>
      %46 = arith.mulf %45, %45 : vector<2x256xf32>
      %cst_27 = arith.constant dense<0.000000e+00> : vector<2xf32>
      %47 = vector.multi_reduction <add>, %46, %cst_27 [1] : vector<2x256xf32> to vector<2xf32>
      %48 = vector.shape_cast %47 : vector<2xf32> to vector<2x1xf32>
      %cst_28 = arith.constant 2.560000e+02 : f32
      %49 = vector.broadcast %cst_28 : f32 to vector<2x1xf32>
      %50 = arith.divf %48, %49 : vector<2x1xf32>
      %cst_29 = arith.constant 9.99999974E-6 : f32
      %51 = vector.broadcast %cst_29 : f32 to vector<2x1xf32>
      %52 = arith.addf %50, %51 : vector<2x1xf32>
      %53 = math.rsqrt %52 : vector<2x1xf32>
      %54 = vector.broadcast %53 : vector<2x1xf32> to vector<2x256xf32>
      %55 = arith.mulf %45, %54 : vector<2x256xf32>
      %c0_30 = arith.constant 0 : index
      %c0_31 = arith.constant 0 : index
      %c0_32 = arith.constant 0 : index
      %56 = vector.load %arg5[%c0_30, %c0_31, %c0_32] : memref<1x2x256xf32, #tpu.memory_space<vmem>>, vector<1x2x256xf32>
      %57 = vector.shape_cast %56 : vector<1x2x256xf32> to vector<2x256xf32>
      %58 = vector.shape_cast %55 : vector<2x256xf32> to vector<1x2x256xf32>
      tpu.vector_store %arg5[%c0_30, %c0_31, %c0_32], %58 {strides = array<i32>} : memref<1x2x256xf32, #tpu.memory_space<vmem>>, vector<1x2x256xf32>,
    } else {
    }
    return
  }
  func.func @transform_0(%arg0: i32, %arg1: i32) -> (i32, i32, i32) {
    %c0_i32 = arith.constant 0 : i32
    %c0_i32_0 = arith.constant 0 : i32
    %c0_i32_1 = arith.constant 0 : i32
    return %arg0, %c0_i32, %c0_i32_0 : i32, i32, i32
  }
  func.func @transform_1(%arg0: i32, %arg1: i32) -> (i32, i32, i32) {
    %c0_i32 = arith.constant 0 : i32
    %c0_i32_0 = arith.constant 0 : i32
    return %arg0, %arg1, %c0_i32 : i32, i32, i32
  }
  func.func @transform_2(%arg0: i32, %arg1: i32) -> (i32, i32, i32) {
    %c0_i32 = arith.constant 0 : i32
    %c0_i32_0 = arith.constant 0 : i32
    %c0_i32_1 = arith.constant 0 : i32
    return %arg0, %c0_i32, %c0_i32_0 : i32, i32, i32
  }
  func.func @transform_3(%arg0: i32, %arg1: i32) -> (i32, i32, i32) {
    %c0_i32 = arith.constant 0 : i32
    %c0_i32_0 = arith.constant 0 : i32
    %c0_i32_1 = arith.constant 0 : i32
    return %arg0, %c0_i32, %c0_i32_0 : i32, i32, i32
  }
}

</mosaic_0001>

<bundles_post_ra>
// kernel: tpu_custom_call.1
= control target key start
LH: loop header
LB: loop body
LE: loop exit
PB: predicated region body
PF: predicated region fallthrough
CT: control target
= control target key end

     0   :  { %8 = vsyncpa [#allocation3], 0  ;;  %s1397_s0 = inlined_call_operand.hbm [shape: bf16[3,2,256], index: 0, kind: input, shape index: {}]   ;;  %s1398_s1 = inlined_call_operand.hbm [shape: bf16[3,256,256], index: 1, kind: input, shape index: {}]   ;;  %s1399_s2 = inlined_call_operand.vmem [shape: bf16[3,2,256], index: 2, kind: input, shape index: {}]   ;;  %s1400_s3 = inlined_call_operand.hbm [shape: f32[3,2,256], index: 3, kind: output, shape index: {}]  }
   0x1   :  { %10 = vsyncpa [#allocation3 + $0x1], 0 }
   0x2   :  { %11 = vsyncpa [#allocation6], 0 }
   0x3   :  { %13 = vsyncpa [#allocation6 + $0x1], 0 }
   0x4   :  { %14 = vsyncpa [#allocation4], 0 }
   0x5   :  { %16 = vsyncpa [#allocation4 + $0x1], 0  ;;  %s1116_s12 = smov 0   ;;  %s1118_s13 = smov 0  }
   0x6   :  { %s1120_s14 = smov 0   ;;  %s1122_s15 = smov 0  }
   0x7   :  { %s1124_s16 = smov 0   ;;  %s1126_s17 = smov 0  }
   0x8 LB: > { %s758_s18 = sadd.s32 4294967295, %s1085_s17   ;;  %s759_s19 = sadd.s32 4294967294, %s1085_s17   ;;  %s1085_s17 = sphi %s1126_s17, %s22_s17   ;;  %s1081_s16 = sphi %s1124_s16, %s1418_s16   ;;  %s1077_s15 = sphi %s1122_s15, %s1417_s15   ;;  %s1073_s14 = sphi %s1120_s14, %s1416_s14   ;;  %s1069_s13 = sphi %s1118_s13, %s1415_s13   ;;  %s1065_s12 = sphi %s1116_s12, %s1414_s12  }
   0x9   : > { %s34_s20 = sadd.s32 1, %s1081_s16  ;;  %s41_s21 = sadd.s32 1, %s1073_s14 }
   0xa   : > { %p36_p0 = scmp.ge.s32.totalorder %s34_s20, 3  ;;  %p48_p1 = scmp.ne.s32.totalorder %s1073_s14, %s1069_s13 }
   0xb   : > { %p49_p2 = scmp.eq.s32.totalorder %s1085_s17, 0  ;;  %p54_p3 = scmp.ne.s32.totalorder %s1069_s13, %s1065_s12 }
   0xc   : > { %s1420_s20 = smov (%p36_p0, %s34_s20), 0  ;;  %p55_p5 = scmp.eq.s32.totalorder %s758_s18, 0 }
   0xd   : > { %p1157_p4 = por %p49_p2, %p48_p1  ;;  %s38_s23 = ssub.s32 %s1081_s16, %s1420_s20 }
   0xe   : > { %p132_p6 = scmp.eq.s32.totalorder %s758_s18, 2  ;;  %p39_p7 = scmp.eq.s32.totalorder %s38_s23, 0 }
   0xf   : > { %p1163_p8 = por %p55_p5, %p54_p3  ;;  %p138_p10 = scmp.eq.s32.totalorder %s759_s19, 2 }
  0x10   : > { %p1167_p9 = por %p132_p6, %p48_p1  ;;  %p831_p12 = scmp.lt.s32.totalorder %s1085_s17, 3 }
  0x11   : > { %s1404_s24 = scalar_select %p1163_p8, 1, 0 }
  0x12   : > { %s1405_s25 = scalar_select %p1167_p9, 1, 0 }
  0x13   : > { %s1172_s26 = scalar_select %p39_p7, %s1073_s14, %s41_s21  }
  0x14   : > { %p1174_p11 = por %p138_p10, %p54_p3  ;;  %s1180_s28 = sand.u32 1, %s1073_s14  }
  0x15   : > { %s762_s29 = sshll.u32 %s1180_s28, 1  ;;  %s811_s30 = sshll.u32 %s1081_s16, 5 }
  0x16   : > { %s1406_s27 = scalar_select %p1174_p11, 1, 0 }
  0x17   : > { %s1187_s6 = scalar_lea.hbm %s1397_s0, %s811_s30  ;;  %s162_s7 = scalar_lea.vmem [#allocation2], %s762_s29 }
  0x18   : > { %s170_s8 = sshll.u32 %s162_s7, 4  ;;  %p1193_p13 = pnand %p831_p12, %p1157_p4  ;;  %s1189_s8 = int_to_ptr.vmem [resolvable:$true] %s170_s8 }
  0x19   : > { %s159_s10 = scalar_lea.sflag [#allocation3], %s1180_s28  ;;  %s939_s11 = scalar_lea.hbm %s1187_s6, 32 }
  0x1a   : > { %p940_p2 = scmp.ne.s32.totalorder %s1187_s6, %s939_s11  ;;  %p941_p3 = pneg %p1193_p13 }
  0x1b   : > { %s944_s21 = scalar_lea.hbm %s1397_s0, 96  ;;  %p945_p4 = scmp.lt.u32.totalorder %s1187_s6, %s1397_s0 }
  0x1c   : > { %p942_p5 = pnand %p941_p3, %p940_p2  ;;  %p946_p7 = scmp.lt.u32.totalorder %s944_s21, %s939_s11 }
  0x1d   : > { %p948_p12 = scmp.lt.u32.totalorder %s939_s11, %s1187_s6 }
  0x1e   : > { %p943_p6 = pneg %p942_p5  ;;  %p947_p10 = por %p946_p7, %p945_p4 }
  0x20   : > { %p949_p0 = por %p948_p12, %p947_p10 }
  0x22   : > { %p950_p1 = pnand %p949_p0, %p943_p6 }
  0x24   : > { %953 = shalt.err (!%p950_p1)
}
  0x25   : > { %s954_s29 = scalar_lea.vmem %s1189_s8, 32  ;;  %s1087_s30 = smov [#allocation2]  }
  0x26   : > { %p955_p2 = scmp.ne.s32.totalorder %s1189_s8, %s954_s29  ;;  %s959_s4 = sshll.u32 %s1087_s30, 4  ;;  %s960_s4 = int_to_ptr.vmem [resolvable:$false] %s959_s4 }
  0x27   : > { %s961_s5 = scalar_lea.vmem %s960_s4, 64  ;;  %p962_p9 = scmp.lt.s32.totalorder %s1189_s8, %s960_s4 }
  0x28   : > { %p957_p5 = pnand %p955_p2, %p941_p3  ;;  %p963_p4 = scmp.lt.s32.totalorder %s961_s5, %s954_s29 }
  0x2a   : > { %p958_p11 = pneg %p957_p5  ;;  %p964_p7 = por %p963_p4, %p962_p9 }
  0x2c   : > { %p965_p10 = pnand %p964_p7, %p958_p11 }
  0x2e   : > { %968 = shalt.err (!%p965_p10)
}
  0x2f   : > { %823 = dma.hbm_to_vmem [thread:$0]  (!%p1193_p13), %s1187_s6, 32, %s1189_s8, %s159_s10  }
  0x30   : > { %p1408_p0 = scmp.lt.s32.totalorder %s1085_s17, 4  ;;  %p1409_p1 = scmp.ge.s32.totalorder %s1085_s17, 1 }
  0x31   : > { %s765_s11 = sshll.u32 %s1180_s28, 8  ;;  %s812_s18 = sshll.u32 %s1081_s16, 12 }
  0x32   : > { %p1229_p6 = pnand %p1409_p1, %p1408_p0  ;;  %s1238_s22 = scalar_lea.hbm %s1398_s1, %s812_s18 }
  0x33   : > { %s181_s23 = scalar_lea.vmem [#allocation5], %s765_s11  ;;  %s178_s6 = scalar_lea.sflag [#allocation6], %s1180_s28 }
  0x34   : > { %s191_s29 = sshll.u32 %s181_s23, 4  ;;  %s969_s8 = scalar_lea.hbm %s1238_s22, 4096  ;;  %s1240_s29 = int_to_ptr.vmem [resolvable:$true] %s191_s29 }
  0x35   : > { %p970_p9 = scmp.ne.s32.totalorder %s1238_s22, %s969_s8  ;;  %s974_s4 = scalar_lea.hbm %s1398_s1, 12288 }
  0x36   : > { %p975_p2 = scmp.lt.u32.totalorder %s1238_s22, %s1398_s1  ;;  %p976_p5 = scmp.lt.u32.totalorder %s974_s4, %s969_s8 }
  0x37   : > { %p972_p11 = pnand %p970_p9, %p941_p3  ;;  %p978_p7 = scmp.lt.u32.totalorder %s969_s8, %s1238_s22 }
  0x38   : > { %p977_p4 = por %p976_p5, %p975_p2 }
  0x39   : > { %p973_p12 = pneg %p972_p11 }
  0x3a   : > { %p979_p10 = por %p978_p7, %p977_p4 }
  0x3c   : > { %p980_p0 = pnand %p979_p10, %p973_p12 }
  0x3e   : > { %983 = shalt.err (!%p980_p0)
}
  0x3f   : > { %s984_s11 = scalar_lea.vmem %s1240_s29, 4096  ;;  %s1088_s19 = smov [#allocation5]  }
  0x40   : > { %p985_p1 = scmp.ne.s32.totalorder %s1240_s29, %s984_s11  ;;  %s989_s21 = sshll.u32 %s1088_s19, 4  ;;  %s990_s21 = int_to_ptr.vmem [resolvable:$false] %s989_s21 }
  0x41   : > { %s991_s23 = scalar_lea.vmem %s990_s21, 8192  ;;  %p992_p8 = scmp.lt.s32.totalorder %s1240_s29, %s990_s21 }
  0x42   : > { %p987_p9 = pnand %p985_p1, %p941_p3  ;;  %p993_p2 = scmp.lt.s32.totalorder %s991_s23, %s984_s11 }
  0x44   : > { %p988_p11 = pneg %p987_p9  ;;  %p994_p5 = por %p993_p2, %p992_p8 }
  0x46   : > { %p995_p4 = pnand %p994_p5, %p988_p11 }
  0x48   : > { %998 = shalt.err (!%p995_p4)
}
  0x49   : > { %s1089_s8 = smov 128   ;;  %s1090_s10 = smov 8  }
  0x4a   : > { %826 = dma.hbm_to_vmem [thread:$0]  (!%p1193_p13), %s1238_s22, 4096, %s1240_s29, %s178_s6, %s1089_s8, %s1089_s8, %s1090_s10  }
  0x4b   : > { %210 = sbr.rel (%p1229_p6) target bundleno = 746 (0x2ea), region = 32  ;;  %s1271_s30 = sand.u32 (!%p1229_p6), 1, %s1069_s13  }
  0x4c   : > { %s769_s4 = sshll.u32 (!%p1229_p6), %s1271_s30, 1  ;;  %s213_s5 = scalar_lea.sflag (!%p1229_p6), [#allocation3], %s1271_s30 }
  0x4d   : > { %s1275_s18 = scalar_lea.vmem (!%p1229_p6), [#allocation2], %s769_s4  ;;  %p1411_p8 = scmp.ne.s32.totalorder (!%p1229_p6), %s1404_s24, 0 }
  0x52   : > { %1052 = dma.done.wait (%p1411_p8), %s213_s5, 32  }
  0x53   : > { %1054 = vsyncadd (%p1411_p8), %s213_s5, 4294967264  ;;  %s770_s28 = sshll.u32 %s1271_s30, 8  ;;  %s222_s9 = scalar_lea.sflag [#allocation6], %s1271_s30 }
  0x54   : > { %s1283_s7 = scalar_lea.vmem [#allocation5], %s770_s28 }
  0x55   : > { %1056 = dma.done.wait (%p1411_p8), %s222_s9, 4096  }
  0x56   : > { %1058 = vsyncadd (%p1411_p8), %s222_s9, 4294963200  ;;  %v887_v0 = vld [vmem:[%s1283_s7 + $0x4] ss:$8 sps:$4 sm:$0xff]   ;;  %v889_v1 = vld [vmem:[%s1283_s7] ss:$8 sps:$4 sm:$0xff]   ;;  %v317_v11 = vlaneseq  ;;  %s771_s24 = sshll.u32 %s1271_s30, 2 }
  0x57   : > { %490 = vmatprep.subr.bf16.mxu0 %v887_v0  ;;  %v890_v2 = vld [vmem:[%s1283_s7 + $0x14] ss:$8 sps:$4 sm:$0xff]   ;;  %v892_v3 = vld [vmem:[%s1283_s7 + $0x10] ss:$8 sps:$4 sm:$0xff]   ;;  %v893_v4 = vld [vmem:[%s1283_s7 + $0x24] ss:$8 sps:$4 sm:$0xff]  }
  0x58   : > { %491 = vmatpush1.bf16.msra.mxu0 %v889_v1  ;;  %v895_v5 = vld [vmem:[%s1283_s7 + $0x20] ss:$8 sps:$4 sm:$0xff]   ;;  %v896_v6 = vld [vmem:[%s1283_s7 + $0x34] ss:$8 sps:$4 sm:$0xff]   ;;  %v898_v7 = vld [vmem:[%s1283_s7 + $0x30] ss:$8 sps:$4 sm:$0xff]  }
  0x59   : > { %492 = vmatprep.subr.bf16.mxu0 %v890_v2  ;;  %v899_v8 = vld [vmem:[%s1283_s7 + $0x44] ss:$8 sps:$4 sm:$0xff]   ;;  %v1091_v9 = vmov 1966171168   ;;  %v901_v12 = vld [vmem:[%s1283_s7 + $0x40] ss:$8 sps:$4 sm:$0xff]  }
  0x5a   : > { %v315_v10 = vunpack.c.l.s4 %v1091_v9  ;;  %v902_v13 = vld [vmem:[%s1283_s7 + $0x54] ss:$8 sps:$4 sm:$0xff]   ;;  %v1300_v15 = vshrl.u32 %v317_v11, 7  ;;  %v904_v16 = vld [vmem:[%s1283_s7 + $0x50] ss:$8 sps:$4 sm:$0xff]   ;;  %s1326_s22 = scalar_lea.vmem [#allocation7], %s771_s24 }
  0x5b   : > { %v905_v17 = vld [vmem:[%s1283_s7 + $0x64] ss:$8 sps:$4 sm:$0xff]   ;;  %v773_v19 = vld.sshfl [vmem:[%s1275_s18] sm:$0x11 pattern:$0x75316420] }
  0x5c   : > { %493 = vmatpush1.bf16.msra.mxu0 %v892_v3  ;;  %v316_v14 = vunpack.c.0.s8 %v315_v10  ;;  %v313_v20 = vcombine.high %v773_v19, %v773_v19  ;;  %v907_v21 = vld [vmem:[%s1283_s7 + $0x60] ss:$8 sps:$4 sm:$0xff]   ;;  %v908_v22 = vld [vmem:[%s1283_s7 + $0x74] ss:$8 sps:$4 sm:$0xff]   ;;  %v910_v24 = vld [vmem:[%s1283_s7 + $0x70] ss:$8 sps:$4 sm:$0xff]  }
  0x5d   : > { %494 = vmatprep.subr.bf16.mxu0 %v893_v4  ;;  %v911_v25 = vld [vmem:[%s1283_s7 + $0x84] ss:$8 sps:$4 sm:$0xff]   ;;  %v913_v26 = vld [vmem:[%s1283_s7 + $0x80] ss:$8 sps:$4 sm:$0xff]   ;;  %v914_v27 = vld [vmem:[%s1283_s7 + $0x94] ss:$8 sps:$4 sm:$0xff]  }
  0x5e   : > { %v319_v18 = vsub.s32 %v316_v14, %v1300_v15  ;;  %v916_v28 = vld [vmem:[%s1283_s7 + $0x90] ss:$8 sps:$4 sm:$0xff]   ;;  %v917_v29 = vld [vmem:[%s1283_s7 + $0xa4] ss:$8 sps:$4 sm:$0xff]   ;;  %v919_v30 = vld [vmem:[%s1283_s7 + $0xa0] ss:$8 sps:$4 sm:$0xff]  }
  0x5f   : > { %v920_v31 = vld [vmem:[%s1283_s7 + $0xb4] ss:$8 sps:$4 sm:$0xff]   ;;  %v922_v32 = vld [vmem:[%s1283_s7 + $0xb0] ss:$8 sps:$4 sm:$0xff]   ;;  %v923_v33 = vld [vmem:[%s1283_s7 + $0xc4] ss:$8 sps:$4 sm:$0xff]  }
  0x60   : > { %495 = vmatpush1.bf16.msra.mxu0 %v895_v5  ;;  %v327_v23 = vrot.slane %v313_v20, %v319_v18  ;;  %v925_v34 = vld [vmem:[%s1283_s7 + $0xc0] ss:$8 sps:$4 sm:$0xff]   ;;  %v926_v35 = vld [vmem:[%s1283_s7 + $0xd4] ss:$8 sps:$4 sm:$0xff]   ;;  %v928_v36 = vld [vmem:[%s1283_s7 + $0xd0] ss:$8 sps:$4 sm:$0xff]   ;;  %v320_v41 = vrot.slane %v773_v19, %v319_v18 }
  0x61   : > { %496 = vmatprep.subr.bf16.mxu0 %v896_v6  ;;  %v929_v37 = vld [vmem:[%s1283_s7 + $0xe4] ss:$8 sps:$4 sm:$0xff]   ;;  %v931_v38 = vld [vmem:[%s1283_s7 + $0xe0] ss:$8 sps:$4 sm:$0xff]   ;;  %v932_v39 = vld [vmem:[%s1283_s7 + $0xf4] ss:$8 sps:$4 sm:$0xff]  }
  0x62   : > { %522 = vmatprep.mubr.bf16.mxu0 %v327_v23  ;;  %v934_v40 = vld [vmem:[%s1283_s7 + $0xf0] ss:$8 sps:$4 sm:$0xff]   ;;  %v1092_v42 = vmov 0.0   ;;  %v1093_v43 = vmov 1983009808   ;;  %p258_p13 = scmp.lt.s32.totalorder %s1077_s15, 2 }
  0x63   : > { %266 = vst [vmem:[%s1326_s22] sm:$0xf] %v1092_v42  ;;  %v535_v44 = vunpack.c.l.s4 %v1093_v43  ;;  %vm577_vm2 = vcmask 1041408   ;;  %v1094_v11 = vmov 269488144   ;;  %s813_s23 = sshll.u32 %s1077_s15, 6  ;;  %s641_s8 = sshll.u32 %s1326_s22, 4  ;;  %s1350_s8 = int_to_ptr.vmem [resolvable:$true] %s641_s8 }
  0x64   : > { %497 = vmatpush1.bf16.msra.mxu0 %v898_v7  ;;  %s259_s29 = scalar_select %p258_p13, %s1077_s15, 2 }
  0x65   : > { %498 = vmatprep.subr.bf16.mxu0 %v899_v8  ;;  %v536_v45 = vunpack.c.0.s8 %v535_v44  ;;  %s1348_s5 = scalar_lea.hbm %s1400_s3, %s813_s23  ;;  %s627_s18 = scalar_lea.sflag [#allocation4], %s1271_s30 }
  0x66   : > { %s772_s6 = sshll.u32 %s259_s29, 1  ;;  %s999_s28 = scalar_lea.vmem %s1350_s8, 64 }
  0x67   : > { %v539_v47 = vsub.s32 %v536_v45, %v1300_v15  ;;  %s261_s21 = scalar_lea.vmem %s1399_s2, %s772_s6  ;;  %p1000_p3 = scmp.ne.s32.totalorder %s1350_s8, %s999_s28 }
  0x68   : > { %499 = vmatpush1.bf16.msra.mxu0 %v901_v12  ;;  %v554_v60 = vld [vmem:[%s261_s21] sm:$0x3]  ;;  %v587_v12 = vunpack.c.l.s4 %v1094_v11  ;;  %p1412_p6 = scmp.ne.s32.totalorder %s1405_s25, 0  ;;  %s1095_s15 = smov [#allocation7]  }
  0x69   : > { %500 = vmatprep.subr.bf16.mxu0 %v902_v13  ;;  %v555_v62 = vunpack.c.l.bf16 %v554_v60  ;;  %s1003_s9 = sshll.u32 %s1095_s15, 4  ;;  %s1004_s9 = int_to_ptr.vmem [resolvable:$false] %s1003_s9 }
  0x6a   : > { %v272_v51 = vld [vmem:[%s1326_s22] sm:$0xf]  ;;  %v588_v13 = vunpack.c.0.s8 %v587_v12  ;;  %p1001_p12 = pnand %p1000_p3, %p1412_p6  ;;  %s1005_s7 = scalar_lea.vmem %s1004_s9, 128 }
  0x6b   : > { %p1006_p10 = scmp.lt.s32.totalorder %s1350_s8, %s1004_s9  ;;  %p1007_p0 = scmp.lt.s32.totalorder %s1005_s7, %s999_s28 }
  0x6c   : > { %501 = vmatpush1.bf16.msra.mxu0 %v904_v16  ;;  %v591_v14 = vsub.s32 %v588_v13, %v1300_v15  ;;  %p1002_p7 = pneg %p1001_p12 }
  0x6d   : > { %502 = vmatprep.subr.bf16.mxu0 %v905_v17  ;;  %p1008_p1 = por %p1007_p0, %p1006_p10 }
  0x6f   : > { %p1009_p9 = pnand %p1008_p1, %p1002_p7 }
  0x70   : > { %503 = vmatpush1.bf16.msra.mxu0 %v907_v21 }
  0x71   : > { %504 = vmatprep.subr.bf16.mxu0 %v908_v22 }
  0x74   : > { %505 = vmatpush1.bf16.msra.mxu0 %v910_v24 }
  0x75   : > { %506 = vmatprep.subr.bf16.mxu0 %v911_v25 }
  0x78   : > { %507 = vmatpush1.bf16.msra.mxu0 %v913_v26 }
  0x79   : > { %508 = vmatprep.subr.bf16.mxu0 %v914_v27 }
  0x7c   : > { %509 = vmatpush1.bf16.msra.mxu0 %v916_v28 }
  0x7d   : > { %510 = vmatprep.subr.bf16.mxu0 %v917_v29 }
  0x80   : > { %511 = vmatpush1.bf16.msra.mxu0 %v919_v30 }
  0x81   : > { %512 = vmatprep.subr.bf16.mxu0 %v920_v31 }
  0x84   : > { %513 = vmatpush1.bf16.msra.mxu0 %v922_v32 }
  0x85   : > { %514 = vmatprep.subr.bf16.mxu0 %v923_v33 }
  0x88   : > { %515 = vmatpush1.bf16.msra.mxu0 %v925_v34 }
  0x89   : > { %516 = vmatprep.subr.bf16.mxu0 %v926_v35 }
  0x8c   : > { %517 = vmatpush1.bf16.msra.mxu0 %v928_v36 }
  0x8d   : > { %518 = vmatprep.subr.bf16.mxu0 %v929_v37 }
  0x90   : > { %519 = vmatpush1.bf16.msra.mxu0 %v931_v38 }
  0x91   : > { %520 = vmatprep.subr.bf16.mxu0 %v932_v39 }
  0x94   : > { %521 = vmatpush1.bf16.msra.mxu0 %v934_v40 }
  0x97   : > { %523 = vmatmul.mubr.bf16.vlgmr.msra.gmra.mrb[0].mxu0 %v320_v41 }
 0x16a   : > { %v524_v46 = vpop.f32.mrb[0].mxu0 }
 0x16b   : > { %v526_v48 = vpop.f32.mrb[1].mxu0 }
 0x16c   : > { %v533_v49 = vcombine.low %v524_v46, %v526_v48  ;;  %v528_v50 = vpop.f32.mrb[2].mxu0 }
 0x16d   : > { %v529_v52 = vpop.f32.mrb[3].mxu0 }
 0x16e   : > { %v540_v53 = vrot.slane %v533_v49, %v539_v47 }
 0x170   : > { %v542_v54 = vadd.f32 %v540_v53, %v272_v51 }
 0x172   : > { %543 = vst [vmem:[%s1326_s22] sm:$0xf] %v542_v54 }
 0x179   : > { %v547_v55 = vld [vmem:[%s1326_s22] sm:$0xf] }
 0x17a   : > { %v549_v56 = vmul.f32 0.6530612, %v547_v55 }
 0x17c   : > { %v551_v57 = vmul.f32 0.015625, %v549_v56 }
 0x17e   : > { %v552_v58 = vadd.f32 2.7083755, %v551_v57 }
 0x180   : > { %v553_v59 = vmax.f32 %v552_v58, 0.0 }
 0x182   : > { %935 = vrsqrt.f32 %v553_v59  ;;  %vm558_vm0 = vcmp.eq.f32.partialorder %v553_v59, inf  ;;  %v561_v0 = vand.u32 2147483648, %v553_v59  ;;  %vm560_vm1 = vcmp.eq.f32.partialorder %v553_v59, 0.0 }
 0x18c   : > { %v936_v61 = vpop.eup %935 }
 0x18d   : > { %v557_v63 = vmul.f32 %v936_v61, %v553_v59 }
 0x18f   : > { %v559_v1 = vsel %vm558_vm0, %v553_v59, %v557_v63 }
 0x190   : > { %v562_v2 = vsel %vm560_vm1, %v561_v0, %v559_v1 }
 0x191   : > { %v563_v3 = vmul.f32 %v562_v2, %v555_v62 }
 0x193   : > { %v564_v4 = vadd.f32 %v563_v3, %v547_v55 }
 0x195   : > { %v565_v5 = vmax.f32 %v564_v4, 0.0 }
 0x197   : > { %v573_v6 = vrot.slane %v565_v5, %v539_v47 }
 0x199   : > { %v574_v7 = vcombine.high %v573_v6, %v573_v6  ;;  %v578_v8 = vsel %vm577_vm2, %v573_v6, 0.0 }
 0x19b   : > { %v579_v9 = vsel %vm577_vm2, %v574_v7, 0.0 }
 0x19c   : > { %v580_v10 = vadd.f32 %v579_v9, %v578_v8 }
 0x19e   : > { %581 = vadd.xlane.f32.xlu0 %v580_v10 }
 0x22b   : > { %v582_v16 = vpop.xlane.xlu0 %581 }
 0x22c   : > { %v584_v17 = vmul.f32 0.00390625, %v582_v16 }
 0x22e   : > { %v592_v18 = vrot.slane %v584_v17, %v591_v14 }
 0x230   : > { %v594_v19 = vsub.f32 %v565_v5, %v592_v18 }
 0x232   : > { %v595_v20 = vmul.f32 %v594_v19, %v594_v19 }
 0x234   : > { %v603_v21 = vrot.slane %v595_v20, %v539_v47 }
 0x236   : > { %v604_v22 = vcombine.high %v603_v21, %v603_v21  ;;  %v607_v23 = vsel %vm577_vm2, %v603_v21, 0.0 }
 0x238   : > { %v608_v24 = vsel %vm577_vm2, %v604_v22, 0.0 }
 0x239   : > { %v609_v25 = vadd.f32 %v608_v24, %v607_v23 }
 0x23b   : > { %610 = vadd.xlane.f32.xlu0 %v609_v25 }
 0x2c8   : > { %v611_v26 = vpop.xlane.xlu0 %610 }
 0x2c9   : > { %v612_v15 = vmul.f32 0.00390625, %v611_v26 }
 0x2cb   : > { %v613_v27 = vadd.f32 1e-05, %v612_v15 }
 0x2cd   : > { %937 = vrsqrt.f32 %v613_v27 }
 0x2d7   : > { %v938_v28 = vpop.eup %937 }
 0x2d8   : > { %v622_v29 = vrot.slane %v938_v28, %v591_v14 }
 0x2da   : > { %v624_v30 = vmul.f32 %v622_v29, %v594_v19 }
 0x2dc   : > { %625 = vst [vmem:[%s1326_s22] sm:$0xf] %v624_v30 }
 0x2dd   : > { %1012 = shalt.err (!%p1009_p9)
}
 0x2de   : > { %s1013_s30 = scalar_lea.hbm %s1348_s5, 64  ;;  %s1017_s29 = scalar_lea.hbm %s1400_s3, 192 }
 0x2df   : > { %p1014_p11 = scmp.ne.s32.totalorder %s1348_s5, %s1013_s30  ;;  %p1018_p4 = scmp.lt.u32.totalorder %s1348_s5, %s1400_s3 }
 0x2e0   : > { %p1019_p8 = scmp.lt.u32.totalorder %s1017_s29, %s1013_s30  ;;  %p1021_p3 = scmp.lt.u32.totalorder %s1013_s30, %s1348_s5 }
 0x2e1   : > { %p1015_p2 = pnand %p1014_p11, %p1412_p6 }
 0x2e2   : > { %p1020_p13 = por %p1019_p8, %p1018_p4 }
 0x2e3   : > { %p1016_p5 = pneg %p1015_p2 }
 0x2e4   : > { %p1022_p12 = por %p1021_p3, %p1020_p13 }
 0x2e6   : > { %p1023_p7 = pnand %p1022_p12, %p1016_p5 }
 0x2e8   : > { %1026 = shalt.err (!%p1023_p7)
}
 0x2e9   : > { %818 = dma.vmem_to_hbm [thread:$0]  (%p1412_p6), %s1350_s8, 64, %s1348_s5, %s627_s18  }
 0x2ea PF: > { %p832_p10 = scmp.ge.s32.totalorder %s1085_s17, 2  ;;  %s653_s19 = sand.u32 1, %s1065_s12  }
 0x2eb   : > { %p1413_p0 = scmp.ne.s32.totalorder %s1406_s27, 0  ;;  %s654_s21 = scalar_lea.sflag [#allocation4], %s653_s19 }
 0x2ed   : > { %p828_p1 = pnand %p832_p10, %p1413_p0 }
 0x2ef   : > { %1060 = dma.done.wait (!%p828_p1), %s654_s21, 64  }
 0x2f0   : > { %1062 = vsyncadd (!%p828_p1), %s654_s21, 4294967232  ;;  %s22_s17 = sadd.s32 1, %s1085_s17   ;;  %s1414_s12 = smov %s1069_s13 }
 0x2f1   : > { %p19_p9 = scmp.ge.s32.totalorder %s22_s17, 5   ;;  %s1415_s13 = smov %s1073_s14 }
 0x2f2   : > { %s1416_s14 = smov %s1172_s26  ;;  %s1417_s15 = smov %s1081_s16 }
 0x2f3   : > { %s1418_s16 = smov %s1420_s20  ;;  %21 = sbr.rel (!%p19_p9) target bundleno = 8 (0x8), region = 102 }
 0x2fa   :  { %659 = vsyncpa [#allocation3], 1 }
 0x2fb   :  { %661 = vsyncpa [#allocation3 + $0x1], 1 }
 0x2fc   :  { %662 = vsyncpa [#allocation6], 1 }
 0x2fd   :  { %664 = vsyncpa [#allocation6 + $0x1], 1 }
 0x2fe   :  { %665 = vsyncpa [#allocation4], 1 }
 0x2ff   :  { %667 = vsyncpa [#allocation4 + $0x1], 1 }

</bundles_post_ra>
